<compile_context>
chip_gen: v6e
topology: v6e:2x2x1
jax: 0.10.0
libtpu: 0.0.40
codegen_flags: <defaults>
</compile_context>

<pallas_src>
from functools import partial

import jax
import jax.numpy as jnp
from jax.experimental import pallas as pl
from jax.experimental.pallas import tpu as pltpu


def triplet_kernel(s1_ref, s2_ref, s3_ref, fused_ref, bias_ref, out_ref, *,
                   margin, batch, seq):
    """Fused forward for all three sentences + masked-mean triplet loss.

    s1_ref/s2_ref/s3_ref: (B, S) int32 token ids in SMEM (scalar reads drive the gather)
    fused_ref:            (V, 1, H) float32 = (emb_table @ W.T)[:, None, :], VMEM resident
    bias_ref:             (1, H) float32 Linear bias, VMEM
    out_ref:              (1, 1) float32 triplet loss, SMEM
    """
    B, S = batch, seq
    bias = bias_ref[...]                                            # (1, H)

    def encode_row(tok_ref, b):
        # max-pool over the sequence of fused (embedding @ W^T) rows: a row gather
        # with a running max.  Identical to max_s(Linear(Embed(tok_s))) pre-bias
        # (padding id 0 maps to the all-zero fused row, as in the reference).
        row = fused_ref[tok_ref[b, 0]]                              # (1, H)
        for s in range(1, S):
            row = jnp.maximum(row, fused_ref[tok_ref[b, s]])
        row = row + bias                                            # bias after pool (exact)
        # L2 normalize; max(sumsq, 1e-24) == torch's max(||v||, 1e-12).
        ssq = jnp.sum(row * row, axis=-1, keepdims=True)            # (1, 1)
        return row * jax.lax.rsqrt(jnp.maximum(ssq, 1e-24))         # (1, H)

    total = jnp.zeros((1, 1), jnp.float32)
    count = jnp.zeros((1, 1), jnp.float32)
    for b in range(B):
        a = encode_row(s1_ref, b)
        p = encode_row(s2_ref, b)
        n = encode_row(s3_ref, b)
        ap = 1.0 - jnp.sum(a * p, axis=-1, keepdims=True)           # (1, 1)
        an = 1.0 - jnp.sum(a * n, axis=-1, keepdims=True)           # (1, 1)
        diff = ap - an + margin
        viol = (diff > 0.0).astype(jnp.float32)
        total = total + viol * diff
        count = count + viol

    # torch.mean of an empty selection is NaN; 0/0 reproduces that.
    loss = total / count
    out_ref[0, 0] = loss[0, 0]


def prepare_triplet_params(emb_table, weight, bias):
    """One-time parameter prep (hoisted out of the per-step function).

    Fuses nn.Embedding and nn.Linear into a single (V, 1, H) table; the padding row
    stays exactly zero since emb_table[0] == 0.
    """
    V, H = emb_table.shape
    fused = jnp.dot(emb_table, weight.T, preferred_element_type=jnp.float32)
    return fused.reshape(V, 1, H).astype(jnp.float32), bias.reshape(1, H).astype(jnp.float32)


def triplet_network(s1, s2, s3, fused_params, margin):
    """TripletNetwork.forward(s1, s2, s3) -> scalar triplet loss.

    Single pallas_call; no surrounding per-step XLA ops.
    """
    fused3, bias2d = fused_params
    B, S = s1.shape
    V, _, H = fused3.shape

    cost = pl.CostEstimate(
        flops=3 * B * (2 * S * H + 6 * H) + 8 * B,
        transcendentals=3 * B,                                     # rsqrt per encoding
        bytes_accessed=4 * (3 * B * S + V * H + H + 1),
    )

    loss = pl.pallas_call(
        partial(triplet_kernel, margin=float(margin), batch=B, seq=S),
        out_shape=jax.ShapeDtypeStruct((1, 1), jnp.float32),
        in_specs=[
            pl.BlockSpec(memory_space=pltpu.MemorySpace.SMEM),     # s1 token ids
            pl.BlockSpec(memory_space=pltpu.MemorySpace.SMEM),     # s2 token ids
            pl.BlockSpec(memory_space=pltpu.MemorySpace.SMEM),     # s3 token ids
            pl.BlockSpec(memory_space=pltpu.MemorySpace.VMEM),     # fused (V,1,H) table
            pl.BlockSpec(memory_space=pltpu.MemorySpace.VMEM),     # bias (1,H)
        ],
        out_specs=pl.BlockSpec(memory_space=pltpu.MemorySpace.SMEM),
        cost_estimate=cost,
    )(s1, s2, s3, fused3, bias2d)
    return loss[0, 0]


def reference_loss(s1, s2, s3, emb_table, weight, bias, margin):
    """Pure-JAX mirror of the PyTorch module (un-fused), for a sanity check."""
    def encode(tok):
        x = emb_table[tok]                                          # (B, S, H)
        y = x @ weight.T + bias                                     # (B, S, H)
        return jnp.max(y, axis=1)                                   # (B, H)

    def normalize(v):
        nrm = jnp.maximum(jnp.sqrt(jnp.sum(v * v, axis=-1, keepdims=True)), 1e-12)
        return v / nrm

    a, p, n = normalize(encode(s1)), normalize(encode(s2)), normalize(encode(s3))
    ap = 1.0 - jnp.sum(a * p, axis=-1)
    an = 1.0 - jnp.sum(a * n, axis=-1)
    diff = ap - an + margin
    m = diff > 0.0
    return jnp.sum(jnp.where(m, diff, 0.0)) / jnp.sum(m.astype(jnp.float32))


if __name__ == "__main__":
    # config = {'vocab_dict': 29, 'hidden_size': 32, 'margin': 0.5}
    VOCAB_DICT, HIDDEN, MARGIN = 29, 32, 0.5
    VOCAB = VOCAB_DICT + 1            # +1 as in SentenceEncoder.__init__
    B, S = 2, 8                       # S kept a multiple of 8 (sublane-clean pooling)

    key = jax.random.PRNGKey(0)
    k_emb, k_w, k_b, k1, k2, k3 = jax.random.split(key, 6)

    # Deterministic synthetic parameters (shapes match nn.Embedding / nn.Linear).
    emb_table = jax.random.normal(k_emb, (VOCAB, HIDDEN), dtype=jnp.float32)
    emb_table = emb_table.at[0].set(0.0)                            # padding_idx=0
    weight = jax.random.normal(k_w, (HIDDEN, HIDDEN), dtype=jnp.float32) * 0.1
    bias = jax.random.normal(k_b, (HIDDEN,), dtype=jnp.float32) * 0.1

    # One-time parameter prep (NOT inside the jitted step): fuse Embedding + Linear.
    fused_params = prepare_triplet_params(emb_table, weight, bias)

    # Deterministic token inputs (include padding id 0 occasionally).
    s1 = jax.random.randint(k1, (B, S), 0, VOCAB, dtype=jnp.int32)
    s2 = jax.random.randint(k2, (B, S), 0, VOCAB, dtype=jnp.int32)
    s3 = jax.random.randint(k3, (B, S), 0, VOCAB, dtype=jnp.int32)

    loss_fn = jax.jit(partial(triplet_network, margin=MARGIN))
    loss = loss_fn(s1, s2, s3, fused_params)
    jax.block_until_ready(loss)

    ref = reference_loss(s1, s2, s3, emb_table, weight, bias, MARGIN)
    assert bool(jnp.allclose(loss, ref, rtol=2e-3, atol=1e-5, equal_nan=True)), (loss, ref)

    print("KERNEL_OK")
</pallas_src>

<mosaic_0001>
module attributes {stable_mosaic.version = 11 : i64} {
  func.func @triplet_kernel(%arg0: memref<2x8xi32, #tpu.memory_space<smem>>, %arg1: memref<2x8xi32, #tpu.memory_space<smem>>, %arg2: memref<2x8xi32, #tpu.memory_space<smem>>, %arg3: memref<30x1x32xf32, #tpu.memory_space<vmem>>, %arg4: memref<1x32xf32, #tpu.memory_space<vmem>>, %arg5: memref<1x1xf32, #tpu.memory_space<smem>>) attributes {dimension_semantics = [], scalar_prefetch = 0 : i64, scratch_operands = 0 : i64, tpu.core_type = #tpu.core_type<tc>} {
    %c0 = arith.constant 0 : index
    %c0_0 = arith.constant 0 : index
    %0 = vector.load %arg4[%c0, %c0_0] : memref<1x32xf32, #tpu.memory_space<vmem>>, vector<1x32xf32>
    %cst = arith.constant 0.000000e+00 : f32
    %1 = vector.broadcast %cst : f32 to vector<1x1xf32>
    %cst_1 = arith.constant 0.000000e+00 : f32
    %2 = vector.broadcast %cst_1 : f32 to vector<1x1xf32>
    %c0_2 = arith.constant 0 : index
    %c0_3 = arith.constant 0 : index
    %3 = memref.load %arg0[%c0_2, %c0_3] : memref<2x8xi32, #tpu.memory_space<smem>>
    %4 = arith.index_cast %3 : i32 to index
    %c0_4 = arith.constant 0 : index
    %c0_5 = arith.constant 0 : index
    %5 = vector.load %arg3[%4, %c0_4, %c0_5] : memref<30x1x32xf32, #tpu.memory_space<vmem>>, vector<1x1x32xf32>
    %6 = vector.shape_cast %5 : vector<1x1x32xf32> to vector<1x32xf32>
    %c0_6 = arith.constant 0 : index
    %c1 = arith.constant 1 : index
    %7 = memref.load %arg0[%c0_6, %c1] : memref<2x8xi32, #tpu.memory_space<smem>>
    %8 = arith.index_cast %7 : i32 to index
    %c0_7 = arith.constant 0 : index
    %c0_8 = arith.constant 0 : index
    %9 = vector.load %arg3[%8, %c0_7, %c0_8] : memref<30x1x32xf32, #tpu.memory_space<vmem>>, vector<1x1x32xf32>
    %10 = vector.shape_cast %9 : vector<1x1x32xf32> to vector<1x32xf32>
    %11 = arith.maximumf %6, %10 : vector<1x32xf32>
    %c0_9 = arith.constant 0 : index
    %c2 = arith.constant 2 : index
    %12 = memref.load %arg0[%c0_9, %c2] : memref<2x8xi32, #tpu.memory_space<smem>>
    %13 = arith.index_cast %12 : i32 to index
    %c0_10 = arith.constant 0 : index
    %c0_11 = arith.constant 0 : index
    %14 = vector.load %arg3[%13, %c0_10, %c0_11] : memref<30x1x32xf32, #tpu.memory_space<vmem>>, vector<1x1x32xf32>
    %15 = vector.shape_cast %14 : vector<1x1x32xf32> to vector<1x32xf32>
    %16 = arith.maximumf %11, %15 : vector<1x32xf32>
    %c0_12 = arith.constant 0 : index
    %c3 = arith.constant 3 : index
    %17 = memref.load %arg0[%c0_12, %c3] : memref<2x8xi32, #tpu.memory_space<smem>>
    %18 = arith.index_cast %17 : i32 to index
    %c0_13 = arith.constant 0 : index
    %c0_14 = arith.constant 0 : index
    %19 = vector.load %arg3[%18, %c0_13, %c0_14] : memref<30x1x32xf32, #tpu.memory_space<vmem>>, vector<1x1x32xf32>
    %20 = vector.shape_cast %19 : vector<1x1x32xf32> to vector<1x32xf32>
    %21 = arith.maximumf %16, %20 : vector<1x32xf32>
    %c0_15 = arith.constant 0 : index
    %c4 = arith.constant 4 : index
    %22 = memref.load %arg0[%c0_15, %c4] : memref<2x8xi32, #tpu.memory_space<smem>>
    %23 = arith.index_cast %22 : i32 to index
    %c0_16 = arith.constant 0 : index
    %c0_17 = arith.constant 0 : index
    %24 = vector.load %arg3[%23, %c0_16, %c0_17] : memref<30x1x32xf32, #tpu.memory_space<vmem>>, vector<1x1x32xf32>
    %25 = vector.shape_cast %24 : vector<1x1x32xf32> to vector<1x32xf32>
    %26 = arith.maximumf %21, %25 : vector<1x32xf32>
    %c0_18 = arith.constant 0 : index
    %c5 = arith.constant 5 : index
    %27 = memref.load %arg0[%c0_18, %c5] : memref<2x8xi32, #tpu.memory_space<smem>>
    %28 = arith.index_cast %27 : i32 to index
    %c0_19 = arith.constant 0 : index
    %c0_20 = arith.constant 0 : index
    %29 = vector.load %arg3[%28, %c0_19, %c0_20] : memref<30x1x32xf32, #tpu.memory_space<vmem>>, vector<1x1x32xf32>
    %30 = vector.shape_cast %29 : vector<1x1x32xf32> to vector<1x32xf32>
    %31 = arith.maximumf %26, %30 : vector<1x32xf32>
    %c0_21 = arith.constant 0 : index
    %c6 = arith.constant 6 : index
    %32 = memref.load %arg0[%c0_21, %c6] : memref<2x8xi32, #tpu.memory_space<smem>>
    %33 = arith.index_cast %32 : i32 to index
    %c0_22 = arith.constant 0 : index
    %c0_23 = arith.constant 0 : index
    %34 = vector.load %arg3[%33, %c0_22, %c0_23] : memref<30x1x32xf32, #tpu.memory_space<vmem>>, vector<1x1x32xf32>
    %35 = vector.shape_cast %34 : vector<1x1x32xf32> to vector<1x32xf32>
    %36 = arith.maximumf %31, %35 : vector<1x32xf32>
    %c0_24 = arith.constant 0 : index
    %c7 = arith.constant 7 : index
    %37 = memref.load %arg0[%c0_24, %c7] : memref<2x8xi32, #tpu.memory_space<smem>>
    %38 = arith.index_cast %37 : i32 to index
    %c0_25 = arith.constant 0 : index
    %c0_26 = arith.constant 0 : index
    %39 = vector.load %arg3[%38, %c0_25, %c0_26] : memref<30x1x32xf32, #tpu.memory_space<vmem>>, vector<1x1x32xf32>
    %40 = vector.shape_cast %39 : vector<1x1x32xf32> to vector<1x32xf32>
    %41 = arith.maximumf %36, %40 : vector<1x32xf32>
    %42 = arith.addf %41, %0 : vector<1x32xf32>
    %43 = arith.mulf %42, %42 : vector<1x32xf32>
    %cst_27 = arith.constant dense<0.000000e+00> : vector<1xf32>
    %44 = vector.multi_reduction <add>, %43, %cst_27 [1] : vector<1x32xf32> to vector<1xf32>
    %45 = vector.shape_cast %44 : vector<1xf32> to vector<1x1xf32>
    %cst_28 = arith.constant 1.000000e-24 : f32
    %46 = vector.broadcast %cst_28 : f32 to vector<1x1xf32>
    %47 = arith.maximumf %45, %46 : vector<1x1xf32>
    %48 = math.rsqrt %47 : vector<1x1xf32>
    %49 = vector.broadcast %48 : vector<1x1xf32> to vector<1x32xf32>
    %50 = arith.mulf %42, %49 : vector<1x32xf32>
    %c0_29 = arith.constant 0 : index
    %c0_30 = arith.constant 0 : index
    %51 = memref.load %arg1[%c0_29, %c0_30] : memref<2x8xi32, #tpu.memory_space<smem>>
    %52 = arith.index_cast %51 : i32 to index
    %c0_31 = arith.constant 0 : index
    %c0_32 = arith.constant 0 : index
    %53 = vector.load %arg3[%52, %c0_31, %c0_32] : memref<30x1x32xf32, #tpu.memory_space<vmem>>, vector<1x1x32xf32>
    %54 = vector.shape_cast %53 : vector<1x1x32xf32> to vector<1x32xf32>
    %c0_33 = arith.constant 0 : index
    %c1_34 = arith.constant 1 : index
    %55 = memref.load %arg1[%c0_33, %c1_34] : memref<2x8xi32, #tpu.memory_space<smem>>
    %56 = arith.index_cast %55 : i32 to index
    %c0_35 = arith.constant 0 : index
    %c0_36 = arith.constant 0 : index
    %57 = vector.load %arg3[%56, %c0_35, %c0_36] : memref<30x1x32xf32, #tpu.memory_space<vmem>>, vector<1x1x32xf32>
    %58 = vector.shape_cast %57 : vector<1x1x32xf32> to vector<1x32xf32>
    %59 = arith.maximumf %54, %58 : vector<1x32xf32>
    %c0_37 = arith.constant 0 : index
    %c2_38 = arith.constant 2 : index
    %60 = memref.load %arg1[%c0_37, %c2_38] : memref<2x8xi32, #tpu.memory_space<smem>>
    %61 = arith.index_cast %60 : i32 to index
    %c0_39 = arith.constant 0 : index
    %c0_40 = arith.constant 0 : index
    %62 = vector.load %arg3[%61, %c0_39, %c0_40] : memref<30x1x32xf32, #tpu.memory_space<vmem>>, vector<1x1x32xf32>
    %63 = vector.shape_cast %62 : vector<1x1x32xf32> to vector<1x32xf32>
    %64 = arith.maximumf %59, %63 : vector<1x32xf32>
    %c0_41 = arith.constant 0 : index
    %c3_42 = arith.constant 3 : index
    %65 = memref.load %arg1[%c0_41, %c3_42] : memref<2x8xi32, #tpu.memory_space<smem>>
    %66 = arith.index_cast %65 : i32 to index
    %c0_43 = arith.constant 0 : index
    %c0_44 = arith.constant 0 : index
    %67 = vector.load %arg3[%66, %c0_43, %c0_44] : memref<30x1x32xf32, #tpu.memory_space<vmem>>, vector<1x1x32xf32>
    %68 = vector.shape_cast %67 : vector<1x1x32xf32> to vector<1x32xf32>
    %69 = arith.maximumf %64, %68 : vector<1x32xf32>
    %c0_45 = arith.constant 0 : index
    %c4_46 = arith.constant 4 : index
    %70 = memref.load %arg1[%c0_45, %c4_46] : memref<2x8xi32, #tpu.memory_space<smem>>
    %71 = arith.index_cast %70 : i32 to index
    %c0_47 = arith.constant 0 : index
    %c0_48 = arith.constant 0 : index
    %72 = vector.load %arg3[%71, %c0_47, %c0_48] : memref<30x1x32xf32, #tpu.memory_space<vmem>>, vector<1x1x32xf32>
    %73 = vector.shape_cast %72 : vector<1x1x32xf32> to vector<1x32xf32>
    %74 = arith.maximumf %69, %73 : vector<1x32xf32>
    %c0_49 = arith.constant 0 : index
    %c5_50 = arith.constant 5 : index
    %75 = memref.load %arg1[%c0_49, %c5_50] : memref<2x8xi32, #tpu.memory_space<smem>>
    %76 = arith.index_cast %75 : i32 to index
    %c0_51 = arith.constant 0 : index
    %c0_52 = arith.constant 0 : index
    %77 = vector.load %arg3[%76, %c0_51, %c0_52] : memref<30x1x32xf32, #tpu.memory_space<vmem>>, vector<1x1x32xf32>
    %78 = vector.shape_cast %77 : vector<1x1x32xf32> to vector<1x32xf32>
    %79 = arith.maximumf %74, %78 : vector<1x32xf32>
    %c0_53 = arith.constant 0 : index
    %c6_54 = arith.constant 6 : index
    %80 = memref.load %arg1[%c0_53, %c6_54] : memref<2x8xi32, #tpu.memory_space<smem>>
    %81 = arith.index_cast %80 : i32 to index
    %c0_55 = arith.constant 0 : index
    %c0_56 = arith.constant 0 : index
    %82 = vector.load %arg3[%81, %c0_55, %c0_56] : memref<30x1x32xf32, #tpu.memory_space<vmem>>, vector<1x1x32xf32>
    %83 = vector.shape_cast %82 : vector<1x1x32xf32> to vector<1x32xf32>
    %84 = arith.maximumf %79, %83 : vector<1x32xf32>
    %c0_57 = arith.constant 0 : index
    %c7_58 = arith.constant 7 : index
    %85 = memref.load %arg1[%c0_57, %c7_58] : memref<2x8xi32, #tpu.memory_space<smem>>
    %86 = arith.index_cast %85 : i32 to index
    %c0_59 = arith.constant 0 : index
    %c0_60 = arith.constant 0 : index
    %87 = vector.load %arg3[%86, %c0_59, %c0_60] : memref<30x1x32xf32, #tpu.memory_space<vmem>>, vector<1x1x32xf32>
    %88 = vector.shape_cast %87 : vector<1x1x32xf32> to vector<1x32xf32>
    %89 = arith.maximumf %84, %88 : vector<1x32xf32>
    %90 = arith.addf %89, %0 : vector<1x32xf32>
    %91 = arith.mulf %90, %90 : vector<1x32xf32>
    %cst_61 = arith.constant dense<0.000000e+00> : vector<1xf32>
    %92 = vector.multi_reduction <add>, %91, %cst_61 [1] : vector<1x32xf32> to vector<1xf32>
    %93 = vector.shape_cast %92 : vector<1xf32> to vector<1x1xf32>
    %cst_62 = arith.constant 1.000000e-24 : f32
    %94 = vector.broadcast %cst_62 : f32 to vector<1x1xf32>
    %95 = arith.maximumf %93, %94 : vector<1x1xf32>
    %96 = math.rsqrt %95 : vector<1x1xf32>
    %97 = vector.broadcast %96 : vector<1x1xf32> to vector<1x32xf32>
    %98 = arith.mulf %90, %97 : vector<1x32xf32>
    %c0_63 = arith.constant 0 : index
    %c0_64 = arith.constant 0 : index
    %99 = memref.load %arg2[%c0_63, %c0_64] : memref<2x8xi32, #tpu.memory_space<smem>>
    %100 = arith.index_cast %99 : i32 to index
    %c0_65 = arith.constant 0 : index
    %c0_66 = arith.constant 0 : index
    %101 = vector.load %arg3[%100, %c0_65, %c0_66] : memref<30x1x32xf32, #tpu.memory_space<vmem>>, vector<1x1x32xf32>
    %102 = vector.shape_cast %101 : vector<1x1x32xf32> to vector<1x32xf32>
    %c0_67 = arith.constant 0 : index
    %c1_68 = arith.constant 1 : index
    %103 = memref.load %arg2[%c0_67, %c1_68] : memref<2x8xi32, #tpu.memory_space<smem>>
    %104 = arith.index_cast %103 : i32 to index
    %c0_69 = arith.constant 0 : index
    %c0_70 = arith.constant 0 : index
    %105 = vector.load %arg3[%104, %c0_69, %c0_70] : memref<30x1x32xf32, #tpu.memory_space<vmem>>, vector<1x1x32xf32>
    %106 = vector.shape_cast %105 : vector<1x1x32xf32> to vector<1x32xf32>
    %107 = arith.maximumf %102, %106 : vector<1x32xf32>
    %c0_71 = arith.constant 0 : index
    %c2_72 = arith.constant 2 : index
    %108 = memref.load %arg2[%c0_71, %c2_72] : memref<2x8xi32, #tpu.memory_space<smem>>
    %109 = arith.index_cast %108 : i32 to index
    %c0_73 = arith.constant 0 : index
    %c0_74 = arith.constant 0 : index
    %110 = vector.load %arg3[%109, %c0_73, %c0_74] : memref<30x1x32xf32, #tpu.memory_space<vmem>>, vector<1x1x32xf32>
    %111 = vector.shape_cast %110 : vector<1x1x32xf32> to vector<1x32xf32>
    %112 = arith.maximumf %107, %111 : vector<1x32xf32>
    %c0_75 = arith.constant 0 : index
    %c3_76 = arith.constant 3 : index
    %113 = memref.load %arg2[%c0_75, %c3_76] : memref<2x8xi32, #tpu.memory_space<smem>>
    %114 = arith.index_cast %113 : i32 to index
    %c0_77 = arith.constant 0 : index
    %c0_78 = arith.constant 0 : index
    %115 = vector.load %arg3[%114, %c0_77, %c0_78] : memref<30x1x32xf32, #tpu.memory_space<vmem>>, vector<1x1x32xf32>
    %116 = vector.shape_cast %115 : vector<1x1x32xf32> to vector<1x32xf32>
    %117 = arith.maximumf %112, %116 : vector<1x32xf32>
    %c0_79 = arith.constant 0 : index
    %c4_80 = arith.constant 4 : index
    %118 = memref.load %arg2[%c0_79, %c4_80] : memref<2x8xi32, #tpu.memory_space<smem>>
    %119 = arith.index_cast %118 : i32 to index
    %c0_81 = arith.constant 0 : index
    %c0_82 = arith.constant 0 : index
    %120 = vector.load %arg3[%119, %c0_81, %c0_82] : memref<30x1x32xf32, #tpu.memory_space<vmem>>, vector<1x1x32xf32>
    %121 = vector.shape_cast %120 : vector<1x1x32xf32> to vector<1x32xf32>
    %122 = arith.maximumf %117, %121 : vector<1x32xf32>
    %c0_83 = arith.constant 0 : index
    %c5_84 = arith.constant 5 : index
    %123 = memref.load %arg2[%c0_83, %c5_84] : memref<2x8xi32, #tpu.memory_space<smem>>
    %124 = arith.index_cast %123 : i32 to index
    %c0_85 = arith.constant 0 : index
    %c0_86 = arith.constant 0 : index
    %125 = vector.load %arg3[%124, %c0_85, %c0_86] : memref<30x1x32xf32, #tpu.memory_space<vmem>>, vector<1x1x32xf32>
    %126 = vector.shape_cast %125 : vector<1x1x32xf32> to vector<1x32xf32>
    %127 = arith.maximumf %122, %126 : vector<1x32xf32>
    %c0_87 = arith.constant 0 : index
    %c6_88 = arith.constant 6 : index
    %128 = memref.load %arg2[%c0_87, %c6_88] : memref<2x8xi32, #tpu.memory_space<smem>>
    %129 = arith.index_cast %128 : i32 to index
    %c0_89 = arith.constant 0 : index
    %c0_90 = arith.constant 0 : index
    %130 = vector.load %arg3[%129, %c0_89, %c0_90] : memref<30x1x32xf32, #tpu.memory_space<vmem>>, vector<1x1x32xf32>
    %131 = vector.shape_cast %130 : vector<1x1x32xf32> to vector<1x32xf32>
    %132 = arith.maximumf %127, %131 : vector<1x32xf32>
    %c0_91 = arith.constant 0 : index
    %c7_92 = arith.constant 7 : index
    %133 = memref.load %arg2[%c0_91, %c7_92] : memref<2x8xi32, #tpu.memory_space<smem>>
    %134 = arith.index_cast %133 : i32 to index
    %c0_93 = arith.constant 0 : index
    %c0_94 = arith.constant 0 : index
    %135 = vector.load %arg3[%134, %c0_93, %c0_94] : memref<30x1x32xf32, #tpu.memory_space<vmem>>, vector<1x1x32xf32>
    %136 = vector.shape_cast %135 : vector<1x1x32xf32> to vector<1x32xf32>
    %137 = arith.maximumf %132, %136 : vector<1x32xf32>
    %138 = arith.addf %137, %0 : vector<1x32xf32>
    %139 = arith.mulf %138, %138 : vector<1x32xf32>
    %cst_95 = arith.constant dense<0.000000e+00> : vector<1xf32>
    %140 = vector.multi_reduction <add>, %139, %cst_95 [1] : vector<1x32xf32> to vector<1xf32>
    %141 = vector.shape_cast %140 : vector<1xf32> to vector<1x1xf32>
    %cst_96 = arith.constant 1.000000e-24 : f32
    %142 = vector.broadcast %cst_96 : f32 to vector<1x1xf32>
    %143 = arith.maximumf %141, %142 : vector<1x1xf32>
    %144 = math.rsqrt %143 : vector<1x1xf32>
    %145 = vector.broadcast %144 : vector<1x1xf32> to vector<1x32xf32>
    %146 = arith.mulf %138, %145 : vector<1x32xf32>
    %147 = arith.mulf %50, %98 : vector<1x32xf32>
    %cst_97 = arith.constant dense<0.000000e+00> : vector<1xf32>
    %148 = vector.multi_reduction <add>, %147, %cst_97 [1] : vector<1x32xf32> to vector<1xf32>
    %149 = vector.shape_cast %148 : vector<1xf32> to vector<1x1xf32>
    %cst_98 = arith.constant 1.000000e+00 : f32
    %150 = vector.broadcast %cst_98 : f32 to vector<1x1xf32>
    %151 = arith.subf %150, %149 : vector<1x1xf32>
    %152 = arith.mulf %50, %146 : vector<1x32xf32>
    %cst_99 = arith.constant dense<0.000000e+00> : vector<1xf32>
    %153 = vector.multi_reduction <add>, %152, %cst_99 [1] : vector<1x32xf32> to vector<1xf32>
    %154 = vector.shape_cast %153 : vector<1xf32> to vector<1x1xf32>
    %cst_100 = arith.constant 1.000000e+00 : f32
    %155 = vector.broadcast %cst_100 : f32 to vector<1x1xf32>
    %156 = arith.subf %155, %154 : vector<1x1xf32>
    %157 = arith.subf %151, %156 : vector<1x1xf32>
    %cst_101 = arith.constant 5.000000e-01 : f32
    %158 = vector.broadcast %cst_101 : f32 to vector<1x1xf32>
    %159 = arith.addf %157, %158 : vector<1x1xf32>
    %cst_102 = arith.constant 0.000000e+00 : f32
    %160 = vector.broadcast %cst_102 : f32 to vector<1x1xf32>
    %161 = arith.cmpf ogt, %159, %160 : vector<1x1xf32>
    %162 = arith.extui %161 : vector<1x1xi1> to vector<1x1xi32>
    %163 = arith.sitofp %162 : vector<1x1xi32> to vector<1x1xf32>
    %164 = arith.mulf %163, %159 : vector<1x1xf32>
    %165 = arith.addf %1, %164 : vector<1x1xf32>
    %166 = arith.addf %2, %163 : vector<1x1xf32>
    %c1_103 = arith.constant 1 : index
    %c0_104 = arith.constant 0 : index
    %167 = memref.load %arg0[%c1_103, %c0_104] : memref<2x8xi32, #tpu.memory_space<smem>>
    %168 = arith.index_cast %167 : i32 to index
    %c0_105 = arith.constant 0 : index
    %c0_106 = arith.constant 0 : index
    %169 = vector.load %arg3[%168, %c0_105, %c0_106] : memref<30x1x32xf32, #tpu.memory_space<vmem>>, vector<1x1x32xf32>
    %170 = vector.shape_cast %169 : vector<1x1x32xf32> to vector<1x32xf32>
    %c1_107 = arith.constant 1 : index
    %c1_108 = arith.constant 1 : index
    %171 = memref.load %arg0[%c1_107, %c1_108] : memref<2x8xi32, #tpu.memory_space<smem>>
    %172 = arith.index_cast %171 : i32 to index
    %c0_109 = arith.constant 0 : index
    %c0_110 = arith.constant 0 : index
    %173 = vector.load %arg3[%172, %c0_109, %c0_110] : memref<30x1x32xf32, #tpu.memory_space<vmem>>, vector<1x1x32xf32>
    %174 = vector.shape_cast %173 : vector<1x1x32xf32> to vector<1x32xf32>
    %175 = arith.maximumf %170, %174 : vector<1x32xf32>
    %c1_111 = arith.constant 1 : index
    %c2_112 = arith.constant 2 : index
    %176 = memref.load %arg0[%c1_111, %c2_112] : memref<2x8xi32, #tpu.memory_space<smem>>
    %177 = arith.index_cast %176 : i32 to index
    %c0_113 = arith.constant 0 : index
    %c0_114 = arith.constant 0 : index
    %178 = vector.load %arg3[%177, %c0_113, %c0_114] : memref<30x1x32xf32, #tpu.memory_space<vmem>>, vector<1x1x32xf32>
    %179 = vector.shape_cast %178 : vector<1x1x32xf32> to vector<1x32xf32>
    %180 = arith.maximumf %175, %179 : vector<1x32xf32>
    %c1_115 = arith.constant 1 : index
    %c3_116 = arith.constant 3 : index
    %181 = memref.load %arg0[%c1_115, %c3_116] : memref<2x8xi32, #tpu.memory_space<smem>>
    %182 = arith.index_cast %181 : i32 to index
    %c0_117 = arith.constant 0 : index
    %c0_118 = arith.constant 0 : index
    %183 = vector.load %arg3[%182, %c0_117, %c0_118] : memref<30x1x32xf32, #tpu.memory_space<vmem>>, vector<1x1x32xf32>
    %184 = vector.shape_cast %183 : vector<1x1x32xf32> to vector<1x32xf32>
    %185 = arith.maximumf %180, %184 : vector<1x32xf32>
    %c1_119 = arith.constant 1 : index
    %c4_120 = arith.constant 4 : index
    %186 = memref.load %arg0[%c1_119, %c4_120] : memref<2x8xi32, #tpu.memory_space<smem>>
    %187 = arith.index_cast %186 : i32 to index
    %c0_121 = arith.constant 0 : index
    %c0_122 = arith.constant 0 : index
    %188 = vector.load %arg3[%187, %c0_121, %c0_122] : memref<30x1x32xf32, #tpu.memory_space<vmem>>, vector<1x1x32xf32>
    %189 = vector.shape_cast %188 : vector<1x1x32xf32> to vector<1x32xf32>
    %190 = arith.maximumf %185, %189 : vector<1x32xf32>
    %c1_123 = arith.constant 1 : index
    %c5_124 = arith.constant 5 : index
    %191 = memref.load %arg0[%c1_123, %c5_124] : memref<2x8xi32, #tpu.memory_space<smem>>
    %192 = arith.index_cast %191 : i32 to index
    %c0_125 = arith.constant 0 : index
    %c0_126 = arith.constant 0 : index
    %193 = vector.load %arg3[%192, %c0_125, %c0_126] : memref<30x1x32xf32, #tpu.memory_space<vmem>>, vector<1x1x32xf32>
    %194 = vector.shape_cast %193 : vector<1x1x32xf32> to vector<1x32xf32>
    %195 = arith.maximumf %190, %194 : vector<1x32xf32>
    %c1_127 = arith.constant 1 : index
    %c6_128 = arith.constant 6 : index
    %196 = memref.load %arg0[%c1_127, %c6_128] : memref<2x8xi32, #tpu.memory_space<smem>>
    %197 = arith.index_cast %196 : i32 to index
    %c0_129 = arith.constant 0 : index
    %c0_130 = arith.constant 0 : index
    %198 = vector.load %arg3[%197, %c0_129, %c0_130] : memref<30x1x32xf32, #tpu.memory_space<vmem>>, vector<1x1x32xf32>
    %199 = vector.shape_cast %198 : vector<1x1x32xf32> to vector<1x32xf32>
    %200 = arith.maximumf %195, %199 : vector<1x32xf32>
    %c1_131 = arith.constant 1 : index
    %c7_132 = arith.constant 7 : index
    %201 = memref.load %arg0[%c1_131, %c7_132] : memref<2x8xi32, #tpu.memory_space<smem>>
    %202 = arith.index_cast %201 : i32 to index
    %c0_133 = arith.constant 0 : index
    %c0_134 = arith.constant 0 : index
    %203 = vector.load %arg3[%202, %c0_133, %c0_134] : memref<30x1x32xf32, #tpu.memory_space<vmem>>, vector<1x1x32xf32>
    %204 = vector.shape_cast %203 : vector<1x1x32xf32> to vector<1x32xf32>
    %205 = arith.maximumf %200, %204 : vector<1x32xf32>
    %206 = arith.addf %205, %0 : vector<1x32xf32>
    %207 = arith.mulf %206, %206 : vector<1x32xf32>
    %cst_135 = arith.constant dense<0.000000e+00> : vector<1xf32>
    %208 = vector.multi_reduction <add>, %207, %cst_135 [1] : vector<1x32xf32> to vector<1xf32>
    %209 = vector.shape_cast %208 : vector<1xf32> to vector<1x1xf32>
    %cst_136 = arith.constant 1.000000e-24 : f32
    %210 = vector.broadcast %cst_136 : f32 to vector<1x1xf32>
    %211 = arith.maximumf %209, %210 : vector<1x1xf32>
    %212 = math.rsqrt %211 : vector<1x1xf32>
    %213 = vector.broadcast %212 : vector<1x1xf32> to vector<1x32xf32>
    %214 = arith.mulf %206, %213 : vector<1x32xf32>
    %c1_137 = arith.constant 1 : index
    %c0_138 = arith.constant 0 : index
    %215 = memref.load %arg1[%c1_137, %c0_138] : memref<2x8xi32, #tpu.memory_space<smem>>
    %216 = arith.index_cast %215 : i32 to index
    %c0_139 = arith.constant 0 : index
    %c0_140 = arith.constant 0 : index
    %217 = vector.load %arg3[%216, %c0_139, %c0_140] : memref<30x1x32xf32, #tpu.memory_space<vmem>>, vector<1x1x32xf32>
    %218 = vector.shape_cast %217 : vector<1x1x32xf32> to vector<1x32xf32>
    %c1_141 = arith.constant 1 : index
    %c1_142 = arith.constant 1 : index
    %219 = memref.load %arg1[%c1_141, %c1_142] : memref<2x8xi32, #tpu.memory_space<smem>>
    %220 = arith.index_cast %219 : i32 to index
    %c0_143 = arith.constant 0 : index
    %c0_144 = arith.constant 0 : index
    %221 = vector.load %arg3[%220, %c0_143, %c0_144] : memref<30x1x32xf32, #tpu.memory_space<vmem>>, vector<1x1x32xf32>
    %222 = vector.shape_cast %221 : vector<1x1x32xf32> to vector<1x32xf32>
    %223 = arith.maximumf %218, %222 : vector<1x32xf32>
    %c1_145 = arith.constant 1 : index
    %c2_146 = arith.constant 2 : index
    %224 = memref.load %arg1[%c1_145, %c2_146] : memref<2x8xi32, #tpu.memory_space<smem>>
    %225 = arith.index_cast %224 : i32 to index
    %c0_147 = arith.constant 0 : index
    %c0_148 = arith.constant 0 : index
    %226 = vector.load %arg3[%225, %c0_147, %c0_148] : memref<30x1x32xf32, #tpu.memory_space<vmem>>, vector<1x1x32xf32>
    %227 = vector.shape_cast %226 : vector<1x1x32xf32> to vector<1x32xf32>
    %228 = arith.maximumf %223, %227 : vector<1x32xf32>
    %c1_149 = arith.constant 1 : index
    %c3_150 = arith.constant 3 : index
    %229 = memref.load %arg1[%c1_149, %c3_150] : memref<2x8xi32, #tpu.memory_space<smem>>
    %230 = arith.index_cast %229 : i32 to index
    %c0_151 = arith.constant 0 : index
    %c0_152 = arith.constant 0 : index
    %231 = vector.load %arg3[%230, %c0_151, %c0_152] : memref<30x1x32xf32, #tpu.memory_space<vmem>>, vector<1x1x32xf32>
    %232 = vector.shape_cast %231 : vector<1x1x32xf32> to vector<1x32xf32>
    %233 = arith.maximumf %228, %232 : vector<1x32xf32>
    %c1_153 = arith.constant 1 : index
    %c4_154 = arith.constant 4 : index
    %234 = memref.load %arg1[%c1_153, %c4_154] : memref<2x8xi32, #tpu.memory_space<smem>>
    %235 = arith.index_cast %234 : i32 to index
    %c0_155 = arith.constant 0 : index
    %c0_156 = arith.constant 0 : index
    %236 = vector.load %arg3[%235, %c0_155, %c0_156] : memref<30x1x32xf32, #tpu.memory_space<vmem>>, vector<1x1x32xf32>
    %237 = vector.shape_cast %236 : vector<1x1x32xf32> to vector<1x32xf32>
    %238 = arith.maximumf %233, %237 : vector<1x32xf32>
    %c1_157 = arith.constant 1 : index
    %c5_158 = arith.constant 5 : index
    %239 = memref.load %arg1[%c1_157, %c5_158] : memref<2x8xi32, #tpu.memory_space<smem>>
    %240 = arith.index_cast %239 : i32 to index
    %c0_159 = arith.constant 0 : index
    %c0_160 = arith.constant 0 : index
    %241 = vector.load %arg3[%240, %c0_159, %c0_160] : memref<30x1x32xf32, #tpu.memory_space<vmem>>, vector<1x1x32xf32>
    %242 = vector.shape_cast %241 : vector<1x1x32xf32> to vector<1x32xf32>
    %243 = arith.maximumf %238, %242 : vector<1x32xf32>
    %c1_161 = arith.constant 1 : index
    %c6_162 = arith.constant 6 : index
    %244 = memref.load %arg1[%c1_161, %c6_162] : memref<2x8xi32, #tpu.memory_space<smem>>
    %245 = arith.index_cast %244 : i32 to index
    %c0_163 = arith.constant 0 : index
    %c0_164 = arith.constant 0 : index
    %246 = vector.load %arg3[%245, %c0_163, %c0_164] : memref<30x1x32xf32, #tpu.memory_space<vmem>>, vector<1x1x32xf32>
    %247 = vector.shape_cast %246 : vector<1x1x32xf32> to vector<1x32xf32>
    %248 = arith.maximumf %243, %247 : vector<1x32xf32>
    %c1_165 = arith.constant 1 : index
    %c7_166 = arith.constant 7 : index
    %249 = memref.load %arg1[%c1_165, %c7_166] : memref<2x8xi32, #tpu.memory_space<smem>>
    %250 = arith.index_cast %249 : i32 to index
    %c0_167 = arith.constant 0 : index
    %c0_168 = arith.constant 0 : index
    %251 = vector.load %arg3[%250, %c0_167, %c0_168] : memref<30x1x32xf32, #tpu.memory_space<vmem>>, vector<1x1x32xf32>
    %252 = vector.shape_cast %251 : vector<1x1x32xf32> to vector<1x32xf32>
    %253 = arith.maximumf %248, %252 : vector<1x32xf32>
    %254 = arith.addf %253, %0 : vector<1x32xf32>
    %255 = arith.mulf %254, %254 : vector<1x32xf32>
    %cst_169 = arith.constant dense<0.000000e+00> : vector<1xf32>
    %256 = vector.multi_reduction <add>, %255, %cst_169 [1] : vector<1x32xf32> to vector<1xf32>
    %257 = vector.shape_cast %256 : vector<1xf32> to vector<1x1xf32>
    %cst_170 = arith.constant 1.000000e-24 : f32
    %258 = vector.broadcast %cst_170 : f32 to vector<1x1xf32>
    %259 = arith.maximumf %257, %258 : vector<1x1xf32>
    %260 = math.rsqrt %259 : vector<1x1xf32>
    %261 = vector.broadcast %260 : vector<1x1xf32> to vector<1x32xf32>
    %262 = arith.mulf %254, %261 : vector<1x32xf32>
    %c1_171 = arith.constant 1 : index
    %c0_172 = arith.constant 0 : index
    %263 = memref.load %arg2[%c1_171, %c0_172] : memref<2x8xi32, #tpu.memory_space<smem>>
    %264 = arith.index_cast %263 : i32 to index
    %c0_173 = arith.constant 0 : index
    %c0_174 = arith.constant 0 : index
    %265 = vector.load %arg3[%264, %c0_173, %c0_174] : memref<30x1x32xf32, #tpu.memory_space<vmem>>, vector<1x1x32xf32>
    %266 = vector.shape_cast %265 : vector<1x1x32xf32> to vector<1x32xf32>
    %c1_175 = arith.constant 1 : index
    %c1_176 = arith.constant 1 : index
    %267 = memref.load %arg2[%c1_175, %c1_176] : memref<2x8xi32, #tpu.memory_space<smem>>
    %268 = arith.index_cast %267 : i32 to index
    %c0_177 = arith.constant 0 : index
    %c0_178 = arith.constant 0 : index
    %269 = vector.load %arg3[%268, %c0_177, %c0_178] : memref<30x1x32xf32, #tpu.memory_space<vmem>>, vector<1x1x32xf32>
    %270 = vector.shape_cast %269 : vector<1x1x32xf32> to vector<1x32xf32>
    %271 = arith.maximumf %266, %270 : vector<1x32xf32>
    %c1_179 = arith.constant 1 : index
    %c2_180 = arith.constant 2 : index
    %272 = memref.load %arg2[%c1_179, %c2_180] : memref<2x8xi32, #tpu.memory_space<smem>>
    %273 = arith.index_cast %272 : i32 to index
    %c0_181 = arith.constant 0 : index
    %c0_182 = arith.constant 0 : index
    %274 = vector.load %arg3[%273, %c0_181, %c0_182] : memref<30x1x32xf32, #tpu.memory_space<vmem>>, vector<1x1x32xf32>
    %275 = vector.shape_cast %274 : vector<1x1x32xf32> to vector<1x32xf32>
    %276 = arith.maximumf %271, %275 : vector<1x32xf32>
    %c1_183 = arith.constant 1 : index
    %c3_184 = arith.constant 3 : index
    %277 = memref.load %arg2[%c1_183, %c3_184] : memref<2x8xi32, #tpu.memory_space<smem>>
    %278 = arith.index_cast %277 : i32 to index
    %c0_185 = arith.constant 0 : index
    %c0_186 = arith.constant 0 : index
    %279 = vector.load %arg3[%278, %c0_185, %c0_186] : memref<30x1x32xf32, #tpu.memory_space<vmem>>, vector<1x1x32xf32>
    %280 = vector.shape_cast %279 : vector<1x1x32xf32> to vector<1x32xf32>
    %281 = arith.maximumf %276, %280 : vector<1x32xf32>
    %c1_187 = arith.constant 1 : index
    %c4_188 = arith.constant 4 : index
    %282 = memref.load %arg2[%c1_187, %c4_188] : memref<2x8xi32, #tpu.memory_space<smem>>
    %283 = arith.index_cast %282 : i32 to index
    %c0_189 = arith.constant 0 : index
    %c0_190 = arith.constant 0 : index
    %284 = vector.load %arg3[%283, %c0_189, %c0_190] : memref<30x1x32xf32, #tpu.memory_space<vmem>>, vector<1x1x32xf32>
    %285 = vector.shape_cast %284 : vector<1x1x32xf32> to vector<1x32xf32>
    %286 = arith.maximumf %281, %285 : vector<1x32xf32>
    %c1_191 = arith.constant 1 : index
    %c5_192 = arith.constant 5 : index
    %287 = memref.load %arg2[%c1_191, %c5_192] : memref<2x8xi32, #tpu.memory_space<smem>>
    %288 = arith.index_cast %287 : i32 to index
    %c0_193 = arith.constant 0 : index
    %c0_194 = arith.constant 0 : index
    %289 = vector.load %arg3[%288, %c0_193, %c0_194] : memref<30x1x32xf32, #tpu.memory_space<vmem>>, vector<1x1x32xf32>
    %290 = vector.shape_cast %289 : vector<1x1x32xf32> to vector<1x32xf32>
    %291 = arith.maximumf %286, %290 : vector<1x32xf32>
    %c1_195 = arith.constant 1 : index
    %c6_196 = arith.constant 6 : index
    %292 = memref.load %arg2[%c1_195, %c6_196] : memref<2x8xi32, #tpu.memory_space<smem>>
    %293 = arith.index_cast %292 : i32 to index
    %c0_197 = arith.constant 0 : index
    %c0_198 = arith.constant 0 : index
    %294 = vector.load %arg3[%293, %c0_197, %c0_198] : memref<30x1x32xf32, #tpu.memory_space<vmem>>, vector<1x1x32xf32>
    %295 = vector.shape_cast %294 : vector<1x1x32xf32> to vector<1x32xf32>
    %296 = arith.maximumf %291, %295 : vector<1x32xf32>
    %c1_199 = arith.constant 1 : index
    %c7_200 = arith.constant 7 : index
    %297 = memref.load %arg2[%c1_199, %c7_200] : memref<2x8xi32, #tpu.memory_space<smem>>
    %298 = arith.index_cast %297 : i32 to index
    %c0_201 = arith.constant 0 : index
    %c0_202 = arith.constant 0 : index
    %299 = vector.load %arg3[%298, %c0_201, %c0_202] : memref<30x1x32xf32, #tpu.memory_space<vmem>>, vector<1x1x32xf32>
    %300 = vector.shape_cast %299 : vector<1x1x32xf32> to vector<1x32xf32>
    %301 = arith.maximumf %296, %300 : vector<1x32xf32>
    %302 = arith.addf %301, %0 : vector<1x32xf32>
    %303 = arith.mulf %302, %302 : vector<1x32xf32>
    %cst_203 = arith.constant dense<0.000000e+00> : vector<1xf32>
    %304 = vector.multi_reduction <add>, %303, %cst_203 [1] : vector<1x32xf32> to vector<1xf32>
    %305 = vector.shape_cast %304 : vector<1xf32> to vector<1x1xf32>
    %cst_204 = arith.constant 1.000000e-24 : f32
    %306 = vector.broadcast %cst_204 : f32 to vector<1x1xf32>
    %307 = arith.maximumf %305, %306 : vector<1x1xf32>
    %308 = math.rsqrt %307 : vector<1x1xf32>
    %309 = vector.broadcast %308 : vector<1x1xf32> to vector<1x32xf32>
    %310 = arith.mulf %302, %309 : vector<1x32xf32>
    %311 = arith.mulf %214, %262 : vector<1x32xf32>
    %cst_205 = arith.constant dense<0.000000e+00> : vector<1xf32>
    %312 = vector.multi_reduction <add>, %311, %cst_205 [1] : vector<1x32xf32> to vector<1xf32>
    %313 = vector.shape_cast %312 : vector<1xf32> to vector<1x1xf32>
    %cst_206 = arith.constant 1.000000e+00 : f32
    %314 = vector.broadcast %cst_206 : f32 to vector<1x1xf32>
    %315 = arith.subf %314, %313 : vector<1x1xf32>
    %316 = arith.mulf %214, %310 : vector<1x32xf32>
    %cst_207 = arith.constant dense<0.000000e+00> : vector<1xf32>
    %317 = vector.multi_reduction <add>, %316, %cst_207 [1] : vector<1x32xf32> to vector<1xf32>
    %318 = vector.shape_cast %317 : vector<1xf32> to vector<1x1xf32>
    %cst_208 = arith.constant 1.000000e+00 : f32
    %319 = vector.broadcast %cst_208 : f32 to vector<1x1xf32>
    %320 = arith.subf %319, %318 : vector<1x1xf32>
    %321 = arith.subf %315, %320 : vector<1x1xf32>
    %cst_209 = arith.constant 5.000000e-01 : f32
    %322 = vector.broadcast %cst_209 : f32 to vector<1x1xf32>
    %323 = arith.addf %321, %322 : vector<1x1xf32>
    %cst_210 = arith.constant 0.000000e+00 : f32
    %324 = vector.broadcast %cst_210 : f32 to vector<1x1xf32>
    %325 = arith.cmpf ogt, %323, %324 : vector<1x1xf32>
    %326 = arith.extui %325 : vector<1x1xi1> to vector<1x1xi32>
    %327 = arith.sitofp %326 : vector<1x1xi32> to vector<1x1xf32>
    %328 = arith.mulf %327, %323 : vector<1x1xf32>
    %329 = arith.addf %165, %328 : vector<1x1xf32>
    %330 = arith.addf %166, %327 : vector<1x1xf32>
    %331 = arith.divf %329, %330 : vector<1x1xf32>
    %332 = vector.extract %331[0, 0] : f32 from vector<1x1xf32>
    %c0_211 = arith.constant 0 : index
    %c0_212 = arith.constant 0 : index
    %333 = memref.load %arg5[%c0_211, %c0_212] : memref<1x1xf32, #tpu.memory_space<smem>>
    memref.store %332, %arg5[%c0_211, %c0_212] : memref<1x1xf32, #tpu.memory_space<smem>>
    return
  }
}

</mosaic_0001>

<bundles_post_ra>
// kernel: triplet_network.1
= control target key start
LH: loop header
LB: loop body
LE: loop exit
PB: predicated region body
PF: predicated region fallthrough
CT: control target
= control target key end

     0   :  { %10 = vsyncpa [#allocation4], 0  ;;  %s725_s0 = inlined_call_operand.hbm [shape: s32[2,8], index: 0, kind: input, shape index: {}]   ;;  %s726_s1 = inlined_call_operand.hbm [shape: s32[2,8], index: 1, kind: input, shape index: {}]   ;;  %s727_s2 = inlined_call_operand.vmem [shape: s32[2,8], index: 2, kind: input, shape index: {}]   ;;  %s728_s3 = inlined_call_operand.hbm [shape: f32[30,1,32], index: 3, kind: input, shape index: {}]   ;;  %s729_s4 = inlined_call_operand.vmem [shape: f32[1,32], index: 4, kind: input, shape index: {}]   ;;  %s730_s5 = inlined_call_operand.hbm [shape: f32[1,1], index: 5, kind: output, shape index: {}]  }
   0x1   :  { %11 = vsyncpa [#allocation8], 0 }
   0x2   :  { %12 = vsyncpa [#allocation6], 0 }
   0x3   :  { %13 = vsyncpa [#allocation3], 0 }
   0x4   :  { %14 = vsyncpa [#allocation5], 0  ;;  %s547_s18 = smov [#allocation2]   ;;  %s548_s21 = smov [#allocation7]  }
   0x5   :  { %22 = dma.hbm_to_smem %s725_s0, 32, %s547_s18, [#allocation4]  }
   0x6   :  { %30 = dma.hbm_to_smem %s726_s1, 32, %s548_s21, [#allocation8]  }
   0x7   :  { %s37_s26 = sshll.u32 %s727_s2, 4  ;;  %s38_s26 = int_to_ptr.vmem [resolvable:$true] %s37_s26 }
   0x8   :  { %s497_s27 = scalar_lea.vmem %s38_s26, 32  ;;  %p502_p1 = scmp.lt.s32.totalorder %s38_s26, %s38_s26 }
   0x9   :  { %p498_p0 = scmp.ne.s32.totalorder %s38_s26, %s497_s27  ;;  %p503_p2 = scmp.lt.s32.totalorder %s497_s27, %s497_s27 }
   0xb   :  { %p504_p3 = por %p503_p2, %p502_p1 }
   0xd   :  { %p505_p4 = pnand %p504_p3, %p498_p0 }
   0xf   :  { %508 = shalt.err (!%p505_p4)
}
  0x10   :  { %s549_s28 = smov [#allocation9]   ;;  %s550_s0 = smov [#allocation10]  }
  0x11   :  { %40 = dma.vmem_to_smem %s38_s26, 32, %s549_s28, [#allocation6]  }
  0x12   :  { %s46_s29 = sshll.u32 %s550_s0, 4  ;;  %s47_s29 = int_to_ptr.vmem [resolvable:$true] %s46_s29 }
  0x13   :  { %s517_s30 = scalar_lea.vmem %s47_s29, 480  ;;  %p522_p6 = scmp.lt.s32.totalorder %s47_s29, %s47_s29 }
  0x14   :  { %p518_p5 = scmp.ne.s32.totalorder %s47_s29, %s517_s30  ;;  %p523_p7 = scmp.lt.s32.totalorder %s517_s30, %s517_s30 }
  0x16   :  { %p524_p8 = por %p523_p7, %p522_p6 }
  0x18   :  { %p525_p9 = pnand %p524_p8, %p518_p5 }
  0x1a   :  { %528 = shalt.err (!%p525_p9)
}
  0x1b   :  { %s551_s1 = smov 16   ;;  %s552_s2 = smov 1  }
  0x1c   :  { %52 = dma.hbm_to_vmem [thread:$0]  %s728_s3, 480, %s47_s29, [#allocation3], %s551_s1, %s551_s1, %s552_s2  }
  0x1d   :  { %537 = dma.done.wait [#allocation4], 32  }
  0x1e   :  { %538 = vsyncadd [#allocation4], 4294967264 }
  0x1f   :  { %539 = dma.done.wait [#allocation8], 32  }
  0x20   :  { %540 = vsyncadd [#allocation8], 4294967264 }
  0x21   :  { %541 = dma.done.wait [#allocation6], 32  }
  0x22   :  { %542 = vsyncadd [#allocation6], 4294967264 }
  0x23   :  { %543 = dma.done.wait [#allocation3], 480  }
  0x24   :  { %544 = vsyncadd [#allocation3], 4294966816 }
  0x25   :  { %67 = sfence }
  0x26   :  { %s148_s8 = sld [smem:[#allocation9]]  ;;  %v610_v18 = vld [vmem:[%s729_s4] sm:$0x1]  ;;  %vm102_vm0 = vcmask 253952  }
  0x27   :  { %s424_s9 = sld [smem:[#allocation9 + $0x1]] }
  0x28   :  { %s425_s10 = sld [smem:[#allocation9 + $0x2]] }
  0x29   :  { %s426_s11 = sld [smem:[#allocation9 + $0x3]] }
  0x2a   :  { %s427_s12 = sld [smem:[#allocation9 + $0x4]] }
  0x2b   :  { %s428_s13 = sld [smem:[#allocation9 + $0x5]] }
  0x2c   :  { %s429_s14 = sld [smem:[#allocation9 + $0x6]]  ;;  %s149_s15 = scalar_lea.vmem [#allocation10], %s148_s8 }
  0x2d   :  { %v150_v0 = vld [vmem:[%s149_s15] sm:$0x1]  ;;  %s430_s16 = sld [smem:[#allocation9 + $0x7]]  ;;  %s152_s3 = scalar_lea.vmem [#allocation10], %s424_s9 }
  0x2e   :  { %v153_v1 = vld [vmem:[%s152_s3] sm:$0x1]  ;;  %s69_s17 = sld [smem:[#allocation2]]  ;;  %s156_s18 = scalar_lea.vmem [#allocation10], %s425_s10 }
  0x2f   :  { %v154_v2 = vmax.f32 %v150_v0, %v153_v1  ;;  %v157_v3 = vld [vmem:[%s156_s18] sm:$0x1]  ;;  %s410_s19 = sld [smem:[#allocation2 + $0x1]]  ;;  %s160_s20 = scalar_lea.vmem [#allocation10], %s426_s11 }
  0x30   :  { %v161_v4 = vld [vmem:[%s160_s20] sm:$0x1]  ;;  %s411_s21 = sld [smem:[#allocation2 + $0x2]]  ;;  %s164_s23 = scalar_lea.vmem [#allocation10], %s427_s12 }
  0x31   :  { %v158_v5 = vmax.f32 %v154_v2, %v157_v3  ;;  %s412_s22 = sld [smem:[#allocation2 + $0x3]]  ;;  %v165_v6 = vld [vmem:[%s164_s23] sm:$0x1]  ;;  %s168_s25 = scalar_lea.vmem [#allocation10], %s428_s13 }
  0x32   :  { %s597_s24 = sld [smem:[#allocation2 + $0x4]]  ;;  %v169_v8 = vld [vmem:[%s168_s25] sm:$0x1]  ;;  %s172_s27 = scalar_lea.vmem [#allocation10], %s429_s14 }
  0x33   :  { %v162_v7 = vmax.f32 %v158_v5, %v161_v4  ;;  %s599_s26 = sld [smem:[#allocation2 + $0x5]]  ;;  %v173_v9 = vld [vmem:[%s172_s27] sm:$0x1]  ;;  %s176_s30 = scalar_lea.vmem [#allocation10], %s430_s16 }
  0x34   :  { %s601_s28 = sld [smem:[#allocation2 + $0x6]]  ;;  %s70_s0 = scalar_lea.vmem [#allocation10], %s69_s17  ;;  %v177_v12 = vld [vmem:[%s176_s30] sm:$0x1] }
  0x35   :  { %v166_v10 = vmax.f32 %v162_v7, %v165_v6  ;;  %v71_v11 = vld [vmem:[%s70_s0] sm:$0x1]  ;;  %s603_s29 = sld [smem:[#allocation2 + $0x7]]  ;;  %s73_s1 = scalar_lea.vmem [#allocation10], %s410_s19 }
  0x36   :  { %v74_v13 = vld [vmem:[%s73_s1] sm:$0x1]  ;;  %s432_s2 = sld [smem:[#allocation2 + $0x80]]  ;;  %s77_s6 = scalar_lea.vmem [#allocation10], %s411_s21 }
  0x37   :  { %v170_v14 = vmax.f32 %v166_v10, %v169_v8  ;;  %v75_v15 = vmax.f32 %v71_v11, %v74_v13  ;;  %v78_v16 = vld [vmem:[%s77_s6] sm:$0x1]  ;;  %s433_s7 = sld [smem:[#allocation2 + $0x81]]  ;;  %s81_s8 = scalar_lea.vmem [#allocation10], %s412_s22 }
  0x38   :  { %v82_v17 = vld [vmem:[%s81_s8] sm:$0x1]  ;;  %s605_s9 = sld [smem:[#allocation2 + $0x82]]  ;;  %s85_s13 = scalar_lea.vmem [#allocation10], %s597_s24 }
  0x39   :  { %v174_v19 = vmax.f32 %v170_v14, %v173_v9  ;;  %v79_v20 = vmax.f32 %v75_v15, %v78_v16  ;;  %s612_s12 = sld [smem:[#allocation2 + $0x83]]  ;;  %v86_v21 = vld [vmem:[%s85_s13] sm:$0x1]  ;;  %s89_s15 = scalar_lea.vmem [#allocation10], %s599_s26 }
  0x3a   :  { %s615_s14 = sld [smem:[#allocation2 + $0x84]]  ;;  %v90_v24 = vld [vmem:[%s89_s15] sm:$0x1]  ;;  %s93_s3 = scalar_lea.vmem [#allocation10], %s601_s28 }
  0x3b   :  { %v178_v22 = vmax.f32 %v174_v19, %v177_v12  ;;  %v83_v23 = vmax.f32 %v79_v20, %v82_v17  ;;  %s618_s16 = sld [smem:[#allocation2 + $0x85]]  ;;  %v94_v25 = vld [vmem:[%s93_s3] sm:$0x1]  ;;  %s97_s19 = scalar_lea.vmem [#allocation10], %s603_s29 }
  0x3c   :  { %s621_s4 = sld [smem:[#allocation2 + $0x86]]  ;;  %s206_s17 = scalar_lea.vmem [#allocation10], %s432_s2  ;;  %v98_v29 = vld [vmem:[%s97_s19] sm:$0x1] }
  0x3d   :  { %v624_v26 = vadd.f32 %v178_v22, %v610_v18  ;;  %v87_v27 = vmax.f32 %v83_v23, %v86_v21  ;;  %v207_v28 = vld [vmem:[%s206_s17] sm:$0x1]  ;;  %s626_s18 = sld [smem:[#allocation2 + $0x87]]  ;;  %s209_s20 = scalar_lea.vmem [#allocation10], %s433_s7 }
  0x3e   :  { %v210_v30 = vld [vmem:[%s209_s20] sm:$0x1]  ;;  %s629_s21 = sld [smem:[#allocation7]]  ;;  %s213_s22 = scalar_lea.vmem [#allocation10], %s605_s9 }
  0x3f   :  { %v180_v31 = vmul.f32 %v624_v26, %v624_v26  ;;  %v91_v32 = vmax.f32 %v87_v27, %v90_v24  ;;  %v211_v33 = vmax.f32 %v207_v28, %v210_v30  ;;  %v214_v34 = vld [vmem:[%s213_s22] sm:$0x1]  ;;  %s417_s23 = sld [smem:[#allocation7 + $0x1]]  ;;  %s217_s24 = scalar_lea.vmem [#allocation10], %s612_s12 }
  0x40   :  { %v218_v35 = vld [vmem:[%s217_s24] sm:$0x1]  ;;  %s635_s25 = sld [smem:[#allocation7 + $0x2]]  ;;  %s221_s27 = scalar_lea.vmem [#allocation10], %s615_s14 }
  0x41   :  { %v181_v36 = vsel %vm102_vm0, %v180_v31, 0.0  ;;  %v95_v37 = vmax.f32 %v91_v32, %v94_v25  ;;  %v215_v38 = vmax.f32 %v211_v33, %v214_v34  ;;  %s638_s26 = sld [smem:[#allocation7 + $0x3]]  ;;  %v222_v39 = vld [vmem:[%s221_s27] sm:$0x1]  ;;  %s225_s0 = scalar_lea.vmem [#allocation10], %s618_s16 }
  0x42   :  { %182 = vadd.xlane.f32.xlu1 %v181_v36  ;;  %s641_s28 = sld [smem:[#allocation7 + $0x4]]  ;;  %v226_v42 = vld [vmem:[%s225_s0] sm:$0x1]  ;;  %s229_s30 = scalar_lea.vmem [#allocation10], %s621_s4 }
  0x43   :  { %v99_v40 = vmax.f32 %v95_v37, %v98_v29  ;;  %v219_v41 = vmax.f32 %v215_v38, %v218_v35  ;;  %s644_s29 = sld [smem:[#allocation7 + $0x5]]  ;;  %v230_v43 = vld [vmem:[%s229_s30] sm:$0x1]  ;;  %s233_s7 = scalar_lea.vmem [#allocation10], %s626_s18 }
  0x44   :  { %s647_s1 = sld [smem:[#allocation7 + $0x6]]  ;;  %s110_s2 = scalar_lea.vmem [#allocation10], %s629_s21  ;;  %v234_v47 = vld [vmem:[%s233_s7] sm:$0x1] }
  0x45   :  { %v650_v44 = vadd.f32 %v99_v40, %v610_v18  ;;  %v223_v45 = vmax.f32 %v219_v41, %v222_v39  ;;  %v111_v46 = vld [vmem:[%s110_s2] sm:$0x1]  ;;  %s653_s6 = sld [smem:[#allocation7 + $0x7]]  ;;  %s113_s8 = scalar_lea.vmem [#allocation10], %s417_s23 }
  0x46   :  { %v114_v48 = vld [vmem:[%s113_s8] sm:$0x1]  ;;  %s656_s9 = sld [smem:[#allocation9 + $0x80]]  ;;  %s117_s10 = scalar_lea.vmem [#allocation10], %s635_s25 }
  0x47   :  { %v101_v49 = vmul.f32 %v650_v44, %v650_v44  ;;  %v227_v50 = vmax.f32 %v223_v45, %v226_v42  ;;  %v115_v51 = vmax.f32 %v111_v46, %v114_v48  ;;  %v118_v52 = vld [vmem:[%s117_s10] sm:$0x1]  ;;  %s449_s11 = sld [smem:[#allocation9 + $0x81]]  ;;  %s121_s12 = scalar_lea.vmem [#allocation10], %s638_s26 }
  0x48   :  { %v122_v53 = vld [vmem:[%s121_s12] sm:$0x1]  ;;  %s662_s13 = sld [smem:[#allocation9 + $0x82]]  ;;  %s125_s15 = scalar_lea.vmem [#allocation10], %s641_s28 }
  0x49   :  { %v103_v54 = vsel %vm102_vm0, %v101_v49, 0.0  ;;  %v231_v55 = vmax.f32 %v227_v50, %v230_v43  ;;  %v119_v56 = vmax.f32 %v115_v51, %v118_v52  ;;  %s665_s14 = sld [smem:[#allocation9 + $0x83]]  ;;  %v126_v57 = vld [vmem:[%s125_s15] sm:$0x1]  ;;  %s129_s3 = scalar_lea.vmem [#allocation10], %s644_s29 }
  0x4a   :  { %104 = vadd.xlane.f32.xlu0 %v103_v54  ;;  %s668_s16 = sld [smem:[#allocation9 + $0x84]]  ;;  %v130_v60 = vld [vmem:[%s129_s3] sm:$0x1]  ;;  %s133_s17 = scalar_lea.vmem [#allocation10], %s647_s1 }
  0x4b   :  { %v235_v58 = vmax.f32 %v231_v55, %v234_v47  ;;  %v123_v59 = vmax.f32 %v119_v56, %v122_v53  ;;  %s671_s4 = sld [smem:[#allocation9 + $0x85]]  ;;  %v134_v61 = vld [vmem:[%s133_s17] sm:$0x1]  ;;  %s137_s21 = scalar_lea.vmem [#allocation10], %s653_s6 }
  0x4c   :  { %s674_s18 = sld [smem:[#allocation9 + $0x86]]  ;;  %s284_s19 = scalar_lea.vmem [#allocation10], %s656_s9  ;;  %v138_v1 = vld [vmem:[%s137_s21] sm:$0x1] }
  0x4d   :  { %v677_v62 = vadd.f32 %v235_v58, %v610_v18  ;;  %v127_v63 = vmax.f32 %v123_v59, %v126_v57  ;;  %v285_v0 = vld [vmem:[%s284_s19] sm:$0x1]  ;;  %s680_s20 = sld [smem:[#allocation9 + $0x87]]  ;;  %s287_s22 = scalar_lea.vmem [#allocation10], %s449_s11 }
  0x4e   :  { %v288_v2 = vld [vmem:[%s287_s22] sm:$0x1]  ;;  %s440_s23 = sld [smem:[#allocation7 + $0x80]]  ;;  %s291_s24 = scalar_lea.vmem [#allocation10], %s662_s13 }
  0x4f   :  { %v237_v3 = vmul.f32 %v677_v62, %v677_v62  ;;  %v131_v4 = vmax.f32 %v127_v63, %v130_v60  ;;  %v289_v5 = vmax.f32 %v285_v0, %v288_v2  ;;  %v292_v6 = vld [vmem:[%s291_s24] sm:$0x1]  ;;  %s441_s25 = sld [smem:[#allocation7 + $0x81]]  ;;  %s295_s26 = scalar_lea.vmem [#allocation10], %s665_s14 }
  0x50   :  { %v296_v7 = vld [vmem:[%s295_s26] sm:$0x1]  ;;  %s442_s27 = sld [smem:[#allocation7 + $0x82]]  ;;  %s299_s0 = scalar_lea.vmem [#allocation10], %s668_s16 }
  0x51   :  { %v238_v8 = vsel %vm102_vm0, %v237_v3, 0.0  ;;  %v135_v9 = vmax.f32 %v131_v4, %v134_v61  ;;  %v293_v10 = vmax.f32 %v289_v5, %v292_v6  ;;  %s443_s28 = sld [smem:[#allocation7 + $0x83]]  ;;  %v300_v11 = vld [vmem:[%s299_s0] sm:$0x1]  ;;  %s303_s1 = scalar_lea.vmem [#allocation10], %s671_s4 }
  0x52   :  { %239 = vadd.xlane.f32.xlu1 %v238_v8  ;;  %s689_s29 = sld [smem:[#allocation7 + $0x84]]  ;;  %v304_v14 = vld [vmem:[%s303_s1] sm:$0x1]  ;;  %s307_s8 = scalar_lea.vmem [#allocation10], %s674_s18 }
  0x53   :  { %v139_v12 = vmax.f32 %v135_v9, %v138_v1  ;;  %v297_v13 = vmax.f32 %v293_v10, %v296_v7  ;;  %s691_s30 = sld [smem:[#allocation7 + $0x85]]  ;;  %v308_v19 = vld [vmem:[%s307_s8] sm:$0x1]  ;;  %s311_s11 = scalar_lea.vmem [#allocation10], %s680_s20 }
  0x54   :  { %s694_s2 = sld [smem:[#allocation7 + $0x86]]  ;;  %s245_s6 = scalar_lea.vmem [#allocation10], %s440_s23  ;;  %v312_v25 = vld [vmem:[%s311_s11] sm:$0x1] }
  0x55   :  { %v697_v15 = vadd.f32 %v139_v12, %v610_v18  ;;  %v301_v16 = vmax.f32 %v297_v13, %v300_v11  ;;  %v246_v17 = vld [vmem:[%s245_s6] sm:$0x1]  ;;  %s699_s7 = sld [smem:[#allocation7 + $0x87]]  ;;  %s248_s9 = scalar_lea.vmem [#allocation10], %s441_s25 }
  0x56   :  { %v249_v20 = vld [vmem:[%s248_s9] sm:$0x1]  ;;  %s252_s10 = scalar_lea.vmem [#allocation10], %s442_s27  ;;  %s554_s4 = smov [#allocation11]  }
  0x57   :  { %v141_v21 = vmul.f32 %v697_v15, %v697_v15  ;;  %v305_v22 = vmax.f32 %v301_v16, %v304_v14  ;;  %v250_v23 = vmax.f32 %v246_v17, %v249_v20  ;;  %v253_v24 = vld [vmem:[%s252_s10] sm:$0x1]  ;;  %s256_s12 = scalar_lea.vmem [#allocation10], %s443_s28 }
  0x58   :  { %v257_v27 = vld [vmem:[%s256_s12] sm:$0x1]  ;;  %s260_s13 = scalar_lea.vmem [#allocation10], %s689_s29 }
  0x59   :  { %v142_v28 = vsel %vm102_vm0, %v141_v21, 0.0  ;;  %v309_v29 = vmax.f32 %v305_v22, %v308_v19  ;;  %v254_v30 = vmax.f32 %v250_v23, %v253_v24  ;;  %v261_v31 = vld [vmem:[%s260_s13] sm:$0x1]  ;;  %s264_s14 = scalar_lea.vmem [#allocation10], %s691_s30 }
  0x5a   :  { %143 = vadd.xlane.f32.xlu0 %v142_v28  ;;  %v265_v34 = vld [vmem:[%s264_s14] sm:$0x1]  ;;  %s268_s15 = scalar_lea.vmem [#allocation10], %s694_s2 }
  0x5b   :  { %v313_v32 = vmax.f32 %v309_v29, %v312_v25  ;;  %v258_v33 = vmax.f32 %v254_v30, %v257_v27  ;;  %v269_v37 = vld [vmem:[%s268_s15] sm:$0x1]  ;;  %s272_s16 = scalar_lea.vmem [#allocation10], %s699_s7  ;;  %v553_v27 = vmov 0.0  }
  0x5c   :  { %v273_v40 = vld [vmem:[%s272_s16] sm:$0x1] }
  0x5d   :  { %v314_v35 = vadd.f32 %v313_v32, %v610_v18  ;;  %v262_v36 = vmax.f32 %v258_v33, %v261_v31 }
  0x5f   :  { %v315_v38 = vmul.f32 %v314_v35, %v314_v35  ;;  %v266_v39 = vmax.f32 %v262_v36, %v265_v34 }
  0x61   :  { %v316_v41 = vsel %vm102_vm0, %v315_v38, 0.0  ;;  %v270_v42 = vmax.f32 %v266_v39, %v269_v37 }
  0x62   :  { %317 = vadd.xlane.f32.xlu1 %v316_v41 }
  0x63   :  { %v274_v43 = vmax.f32 %v270_v42, %v273_v40 }
  0x65   :  { %v275_v45 = vadd.f32 %v274_v43, %v610_v18 }
  0x67   :  { %v276_v46 = vmul.f32 %v275_v45, %v275_v45 }
  0x69   :  { %v277_v47 = vsel %vm102_vm0, %v276_v46, 0.0 }
  0x6a   :  { %278 = vadd.xlane.f32.xlu0 %v277_v47 }
  0xcb   :  { %v183_v48 = vpop.xlane.xlu1 %182 }
  0xcc   :  { %v184_v49 = vmax.f32 %v183_v48, 1e-24 }
  0xce   :  { %467 = vrsqrt.f32 %v184_v49 }
  0xd3   :  { %v105_v50 = vpop.xlane.xlu0 %104 }
  0xd4   :  { %v106_v51 = vmax.f32 %v105_v50, 1e-24 }
  0xd6   :  { %469 = vrsqrt.f32 %v106_v51 }
  0xdb   :  { %v468_v52 = vpop.eup %467  ;;  %v240_v58 = vpop.xlane.xlu1 %239 }
  0xdc   :  { %v186_v53 = vmul.f32 %v468_v52, %v624_v26  ;;  %v241_v59 = vmax.f32 %v240_v58, 1e-24 }
  0xe3   :  { %v470_v54 = vpop.eup %469  ;;  %v144_v55 = vpop.xlane.xlu0 %143 }
  0xe4   :  { %v145_v56 = vmax.f32 %v144_v55, 1e-24  ;;  %v108_v57 = vmul.f32 %v470_v54, %v650_v44 }
  0xe6   :  { %471 = vrsqrt.f32 %v145_v56  ;;  %v192_v18 = vmul.f32 %v186_v53, %v108_v57 }
  0xe7   :  { %473 = vrsqrt.f32 %v241_v59 }
  0xe8   :  { %v193_v60 = vsel %vm102_vm0, %v192_v18, 0.0 }
  0xe9   :  { %194 = vadd.xlane.f32.xlu1 %v193_v60 }
  0xeb   :  { %v318_v61 = vpop.xlane.xlu1 %317 }
  0xec   :  { %v319_v63 = vmax.f32 %v318_v61, 1e-24 }
  0xee   :  { %475 = vrsqrt.f32 %v319_v63 }
  0xf3   :  { %v472_v0 = vpop.eup %471  ;;  %v279_v1 = vpop.xlane.xlu0 %278 }
  0xf4   :  { %v280_v2 = vmax.f32 %v279_v1, 1e-24  ;;  %v147_v26 = vmul.f32 %v472_v0, %v697_v15  ;;  %v474_v4 = vpop.eup %473 }
  0xf5   :  { %v243_v6 = vmul.f32 %v474_v4, %v677_v62 }
  0xf6   :  { %477 = vrsqrt.f32 %v280_v2  ;;  %v187_v3 = vmul.f32 %v147_v26, %v108_v57 }
  0xf8   :  { %v188_v44 = vsel %vm102_vm0, %v187_v3, 0.0 }
  0xf9   :  { %189 = vadd.xlane.f32.xlu0 %v188_v44 }
  0xfb   :  { %v476_v5 = vpop.eup %475 }
  0xfc   :  { %v321_v7 = vmul.f32 %v476_v5, %v314_v35 }
  0xfe   :  { %v327_v8 = vmul.f32 %v321_v7, %v243_v6 }
 0x100   :  { %v328_v9 = vsel %vm102_vm0, %v327_v8, 0.0 }
 0x101   :  { %329 = vadd.xlane.f32.xlu1 %v328_v9 }
 0x103   :  { %v478_v10 = vpop.eup %477 }
 0x104   :  { %v282_v11 = vmul.f32 %v478_v10, %v275_v45 }
 0x106   :  { %v322_v12 = vmul.f32 %v282_v11, %v243_v6 }
 0x108   :  { %v323_v13 = vsel %vm102_vm0, %v322_v12, 0.0 }
 0x109   :  { %324 = vadd.xlane.f32.xlu0 %v323_v13 }
 0x172   :  { %v195_v15 = vpop.xlane.xlu1 %194 }
 0x173   :  { %v196_v17 = vsub.f32 1.0, %v195_v15 }
 0x182   :  { %v190_v14 = vpop.xlane.xlu0 %189 }
 0x183   :  { %v191_v16 = vsub.f32 1.0, %v190_v14 }
 0x185   :  { %v197_v20 = vsub.f32 %v191_v16, %v196_v17 }
 0x187   :  { %v198_v62 = vadd.f32 0.5, %v197_v20 }
 0x189   :  { %vm199_vm1 = vcmp.gt.f32.partialorder %v198_v62, 0.0 }
 0x18a   :  { %v330_v19 = vpop.xlane.xlu1 %329  ;;  %v431_v28 = vsel %vm199_vm1, 1.0, %v553_v27 }
 0x18b   :  { %v331_v21 = vsub.f32 1.0, %v330_v19  ;;  %v202_v32 = vmul.f32 %v431_v28, %v198_v62 }
 0x192   :  { %v325_v22 = vpop.xlane.xlu0 %324 }
 0x193   :  { %v326_v23 = vsub.f32 1.0, %v325_v22 }
 0x195   :  { %v332_v24 = vsub.f32 %v326_v23, %v331_v21 }
 0x197   :  { %v333_v25 = vadd.f32 0.5, %v332_v24 }
 0x199   :  { %vm334_vm2 = vcmp.gt.f32.partialorder %v333_v25, 0.0 }
 0x19a   :  { %v456_v29 = vsel %vm334_vm2, 1.0, %v553_v27 }
 0x19b   :  { %v339_v30 = vadd.f32 %v456_v29, %v431_v28  ;;  %v337_v31 = vmul.f32 %v456_v29, %v333_v25 }
 0x19d   :  { %479 = vrcp.f32 %v339_v30  ;;  %v338_v33 = vadd.f32 %v337_v31, %v202_v32 }
 0x1aa   :  { %v480_v34 = vpop.eup %479 }
 0x1ab   :  { %v341_v35 = vmul.f32 %v480_v34, %v338_v33 }
 0x1ad   :  { %457 = vpush %v341_v35 }
 0x1de   :  { %s458_s3 = spop %457 }
 0x1df   :  { %344 = sst [smem:[#allocation11]] %s458_s3 }
 0x1e0   :  { %352 = dma.smem_to_hbm %s554_s4, 16, %s730_s5, [#allocation5]  }
 0x1e1   :  { %545 = dma.done.wait [#allocation5], 16  }
 0x1e2   :  { %546 = vsyncadd [#allocation5], 4294967280 }
 0x1e3   :  { %356 = sfence }
 0x1e4   :  { %357 = vsyncpa [#allocation3], 1 }
 0x1e5   :  { %358 = vsyncpa [#allocation4], 1 }
 0x1e6   :  { %359 = vsyncpa [#allocation8], 1 }
 0x1e7   :  { %360 = vsyncpa [#allocation5], 1 }
 0x1e8   :  { %361 = vsyncpa [#allocation6], 1 }

</bundles_post_ra>
